<compile_context>
chip_gen: v6e
topology: v6e:2x2x1
jax: 0.10.0
libtpu: 0.0.40
codegen_flags: <defaults>
</compile_context>

<pallas_src>
import functools

import jax
import jax.numpy as jnp
from jax.experimental import pallas as pl
from jax.experimental.pallas import tpu as pltpu

_LANE = 128
_SUBLANE = 8


def _round_up(n, m):
    return ((n + m - 1) // m) * m


def _orthogonal(key, rows, cols, dtype=jnp.float32):
    """Deterministic orthogonal init (same spirit as nn.init.orthogonal_)."""
    n = max(rows, cols)
    a = jax.random.normal(key, (n, n), dtype=jnp.float32)
    q, r = jnp.linalg.qr(a)
    s = jnp.sign(jnp.diag(r))
    s = jnp.where(s == 0, 1.0, s)  # never zero a column on a degenerate R diagonal
    q = q * s[None, :]
    return q[:rows, :cols].astype(dtype)


def _mlp_kernel(x_ref,
                w1_ref, b1_ref,
                w2_ref, b2_ref,
                w3_ref, b3_ref,
                wh_ref, bh_ref,
                out_ref):
    """Whole forward pass for one batch tile; all operands resident in VMEM.

    Matmuls run in the weights' dtype (f32 or bf16) with f32 MXU accumulation;
    bias adds and ReLUs stay in f32 on the VPU.
    """
    cdt = w1_ref.dtype
    x = x_ref[...]

    h = jnp.dot(x, w1_ref[...], preferred_element_type=jnp.float32) + b1_ref[...]
    h = jnp.maximum(h, 0.0).astype(cdt)

    h = jnp.dot(h, w2_ref[...], preferred_element_type=jnp.float32) + b2_ref[...]
    h = jnp.maximum(h, 0.0).astype(cdt)

    h = jnp.dot(h, w3_ref[...], preferred_element_type=jnp.float32) + b3_ref[...]
    h = jnp.maximum(h, 0.0).astype(cdt)

    # Fused (policy || value || zero-pad) head: one lane-dense output store.
    out_ref[...] = (
        jnp.dot(h, wh_ref[...], preferred_element_type=jnp.float32) + bh_ref[...]
    ).astype(out_ref.dtype)


@functools.partial(jax.jit, static_argnames=("batch_tile", "compute_dtype"))
def lost_cities_forward(x, params, *, batch_tile=1024, compute_dtype=jnp.float32):
    """LostCitiesNet forward pass via a single Pallas kernel.

    Args:
      x: (B, state_size) float32 input states (any B >= 1).
      params: dict with w1,b1,w2,b2,w3,b3,wp,bp,wv,bv; weights are (in, out).
      batch_tile: max rows of x processed per grid step (rounded/capped inside).
      compute_dtype: dtype for x / weights feeding the MXU (f32 or bf16).

    Returns:
      (policy_logits (B, action_size), value (B, 1)), both float32.
    """
    B, S = x.shape
    H = params["w1"].shape[1]
    A = params["wp"].shape[1]
    P = _round_up(A + 1, _LANE)  # fused, lane-dense head width (>=128)

    # ---- fuse policy + value heads into one zero-padded (H, P) matmul ------
    wh = jnp.concatenate([params["wp"], params["wv"]], axis=1)
    wh = jnp.pad(wh, ((0, 0), (0, P - (A + 1))))
    bh = jnp.concatenate([params["bp"], params["bv"]], axis=1)
    bh = jnp.pad(bh, ((0, 0), (0, P - (A + 1))))

    # ---- choose batch tile: multiple of 8, keep >=2 grid steps if possible --
    bt = _round_up(max(1, min(batch_tile, B)), _SUBLANE)
    if B >= 2 * _SUBLANE:
        half = max(_SUBLANE,
                   (_round_up(B, _SUBLANE) // 2) // _SUBLANE * _SUBLANE)
        bt = min(bt, half)  # >=2 "parallel" steps -> v7x megacore shards batch
    Bp = _round_up(B, bt)
    xp = jnp.pad(x, ((0, Bp - B), (0, 0)))  # padded rows are sliced off below

    cast = lambda a: a.astype(compute_dtype)
    f32 = lambda a: a.astype(jnp.float32)

    rowblk = lambda i: (i, 0)  # batch-tiled arrays
    full = lambda i: (0, 0)    # weights/biases: same (resident) block every step

    grid_spec = pl.GridSpec(
        grid=(Bp // bt,),
        in_specs=[
            pl.BlockSpec((bt, S), rowblk),                            # x tile
            pl.BlockSpec((S, H), full), pl.BlockSpec((1, H), full),   # fc1
            pl.BlockSpec((H, H), full), pl.BlockSpec((1, H), full),   # fc2
            pl.BlockSpec((H, H), full), pl.BlockSpec((1, H), full),   # fc3
            pl.BlockSpec((H, P), full), pl.BlockSpec((1, P), full),   # fused heads
        ],
        out_specs=pl.BlockSpec((bt, P), rowblk),
    )

    out = pl.pallas_call(
        _mlp_kernel,
        out_shape=jax.ShapeDtypeStruct((Bp, P), jnp.float32),
        grid_spec=grid_spec,
        compiler_params=pltpu.CompilerParams(
            dimension_semantics=("parallel",),
            # x tile + output tile double-buffered stays <<32 MiB even at
            # multi-thousand-row tiles; safe on v5e/v6e (128 MiB) and v7x (64 MiB).
            vmem_limit_bytes=32 * 1024 * 1024,
        ),
    )(
        cast(xp),
        cast(params["w1"]), f32(params["b1"]),
        cast(params["w2"]), f32(params["b2"]),
        cast(params["w3"]), f32(params["b3"]),
        cast(wh), f32(bh),
    )

    out = out[:B]
    return out[:, :A], out[:, A:A + 1]


def init_params(key, state_size, action_size, hidden_size):
    """Deterministic parameter init mirroring LostCitiesNet.__init__ shapes."""
    keys = jax.random.split(key, 5)
    # Stored as (in, out) = transpose of PyTorch nn.Linear weight (out, in).
    return {
        "w1": _orthogonal(keys[0], state_size, hidden_size),
        "b1": jnp.zeros((1, hidden_size), jnp.float32),
        "w2": _orthogonal(keys[1], hidden_size, hidden_size),
        "b2": jnp.zeros((1, hidden_size), jnp.float32),
        "w3": _orthogonal(keys[2], hidden_size, hidden_size),
        "b3": jnp.zeros((1, hidden_size), jnp.float32),
        "wp": _orthogonal(keys[3], hidden_size, action_size),
        "bp": jnp.zeros((1, action_size), jnp.float32),
        "wv": _orthogonal(keys[4], hidden_size, 1),
        "bv": jnp.zeros((1, 1), jnp.float32),
    }


def reference_forward(x, params):
    """Pure-JAX reference matching the PyTorch forward semantics."""
    h = jax.nn.relu(x @ params["w1"] + params["b1"])
    h = jax.nn.relu(h @ params["w2"] + params["b2"])
    h = jax.nn.relu(h @ params["w3"] + params["b3"])
    policy = h @ params["wp"] + params["bp"]
    value = h @ params["wv"] + params["bv"]
    return policy, value


if __name__ == "__main__":
    # Small shapes consistent with the module's forward.
    batch, state_size, action_size, hidden_size = 16, 32, 16, 32

    key = jax.random.PRNGKey(0)
    k_x, k_p = jax.random.split(key)
    x = jax.random.normal(k_x, (batch, state_size), dtype=jnp.float32)
    params = init_params(k_p, state_size, action_size, hidden_size)

    ref_policy, ref_value = reference_forward(x, params)

    # f32 path (tight tolerance); small tile -> 2 grid steps (megacore-friendly).
    policy, value = lost_cities_forward(x, params, batch_tile=8,
                                        compute_dtype=jnp.float32)
    jax.block_until_ready((policy, value))
    assert policy.shape == (batch, action_size)
    assert value.shape == (batch, 1)
    assert jnp.allclose(policy, ref_policy, atol=1e-5, rtol=1e-5)
    assert jnp.allclose(value, ref_value, atol=1e-5, rtol=1e-5)

    # bf16 weights/activations (MXU-native on v5e/v6e/v7x), f32 accumulation.
    policy_bf, value_bf = lost_cities_forward(x, params, batch_tile=8,
                                              compute_dtype=jnp.bfloat16)
    jax.block_until_ready((policy_bf, value_bf))
    assert jnp.allclose(policy_bf, ref_policy, atol=1e-1, rtol=5e-2)
    assert jnp.allclose(value_bf, ref_value, atol=1e-1, rtol=5e-2)

    # Ragged batch exercises the cdiv/padding path (no divisibility requirement).
    policy_r, value_r = lost_cities_forward(x[:11], params)
    jax.block_until_ready((policy_r, value_r))
    assert policy_r.shape == (11, action_size)
    assert value_r.shape == (11, 1)
    assert jnp.allclose(policy_r, ref_policy[:11], atol=1e-5, rtol=1e-5)
    assert jnp.allclose(value_r, ref_value[:11], atol=1e-5, rtol=1e-5)

    print("KERNEL_OK")
</pallas_src>

<mosaic_0001>
module attributes {stable_mosaic.version = 11 : i64} {
  func.func @_mlp_kernel(%arg0: i32, %arg1: memref<8x32xf32, #tpu.memory_space<vmem>>, %arg2: memref<32x32xf32, #tpu.memory_space<vmem>>, %arg3: memref<1x32xf32, #tpu.memory_space<vmem>>, %arg4: memref<32x32xf32, #tpu.memory_space<vmem>>, %arg5: memref<1x32xf32, #tpu.memory_space<vmem>>, %arg6: memref<32x32xf32, #tpu.memory_space<vmem>>, %arg7: memref<1x32xf32, #tpu.memory_space<vmem>>, %arg8: memref<32x128xf32, #tpu.memory_space<vmem>>, %arg9: memref<1x128xf32, #tpu.memory_space<vmem>>, %arg10: memref<8x128xf32, #tpu.memory_space<vmem>>) attributes {dimension_semantics = [#tpu.dimension_semantics<parallel>], iteration_bounds = array<i64: 2>, scalar_prefetch = 0 : i64, scratch_operands = 0 : i64, tpu.core_type = #tpu.core_type<tc>, window_params = [{transform_indices = @transform_0, window_bounds = array<i64: 8, 32>}, {pipeline_mode = #tpu.pipeline_mode<synchronous>, transform_indices = @transform_1, window_bounds = array<i64: 32, 32>}, {pipeline_mode = #tpu.pipeline_mode<synchronous>, transform_indices = @transform_2, window_bounds = array<i64: 1, 32>}, {pipeline_mode = #tpu.pipeline_mode<synchronous>, transform_indices = @transform_3, window_bounds = array<i64: 32, 32>}, {pipeline_mode = #tpu.pipeline_mode<synchronous>, transform_indices = @transform_4, window_bounds = array<i64: 1, 32>}, {pipeline_mode = #tpu.pipeline_mode<synchronous>, transform_indices = @transform_5, window_bounds = array<i64: 32, 32>}, {pipeline_mode = #tpu.pipeline_mode<synchronous>, transform_indices = @transform_6, window_bounds = array<i64: 1, 32>}, {pipeline_mode = #tpu.pipeline_mode<synchronous>, transform_indices = @transform_7, window_bounds = array<i64: 32, 128>}, {pipeline_mode = #tpu.pipeline_mode<synchronous>, transform_indices = @transform_8, window_bounds = array<i64: 1, 128>}, {transform_indices = @transform_9, window_bounds = array<i64: 8, 128>}]} {
    %c0 = arith.constant 0 : index
    %c0_0 = arith.constant 0 : index
    %0 = vector.load %arg1[%c0, %c0_0] : memref<8x32xf32, #tpu.memory_space<vmem>>, vector<8x32xf32>
    %c0_1 = arith.constant 0 : index
    %c0_2 = arith.constant 0 : index
    %1 = vector.load %arg2[%c0_1, %c0_2] : memref<32x32xf32, #tpu.memory_space<vmem>>, vector<32x32xf32>
    %cst = arith.constant dense<0.000000e+00> : vector<8x32xf32>
    %2 = tpu.matmul %0, %1, %cst {dimension_numbers = #tpu.dot_dimension_numbers<[1], [0], [0], [1], [0, 0, 1, 1], [], []>} : vector<8x32xf32>, vector<32x32xf32>, vector<8x32xf32> -> vector<8x32xf32>
    %c0_3 = arith.constant 0 : index
    %c0_4 = arith.constant 0 : index
    %3 = vector.load %arg3[%c0_3, %c0_4] : memref<1x32xf32, #tpu.memory_space<vmem>>, vector<1x32xf32>
    %4 = vector.broadcast %3 : vector<1x32xf32> to vector<8x32xf32>
    %5 = arith.addf %2, %4 : vector<8x32xf32>
    %cst_5 = arith.constant 0.000000e+00 : f32
    %6 = vector.broadcast %cst_5 : f32 to vector<8x32xf32>
    %7 = arith.maximumf %5, %6 : vector<8x32xf32>
    %c0_6 = arith.constant 0 : index
    %c0_7 = arith.constant 0 : index
    %8 = vector.load %arg4[%c0_6, %c0_7] : memref<32x32xf32, #tpu.memory_space<vmem>>, vector<32x32xf32>
    %cst_8 = arith.constant dense<0.000000e+00> : vector<8x32xf32>
    %9 = tpu.matmul %7, %8, %cst_8 {dimension_numbers = #tpu.dot_dimension_numbers<[1], [0], [0], [1], [0, 0, 1, 1], [], []>} : vector<8x32xf32>, vector<32x32xf32>, vector<8x32xf32> -> vector<8x32xf32>
    %c0_9 = arith.constant 0 : index
    %c0_10 = arith.constant 0 : index
    %10 = vector.load %arg5[%c0_9, %c0_10] : memref<1x32xf32, #tpu.memory_space<vmem>>, vector<1x32xf32>
    %11 = vector.broadcast %10 : vector<1x32xf32> to vector<8x32xf32>
    %12 = arith.addf %9, %11 : vector<8x32xf32>
    %cst_11 = arith.constant 0.000000e+00 : f32
    %13 = vector.broadcast %cst_11 : f32 to vector<8x32xf32>
    %14 = arith.maximumf %12, %13 : vector<8x32xf32>
    %c0_12 = arith.constant 0 : index
    %c0_13 = arith.constant 0 : index
    %15 = vector.load %arg6[%c0_12, %c0_13] : memref<32x32xf32, #tpu.memory_space<vmem>>, vector<32x32xf32>
    %cst_14 = arith.constant dense<0.000000e+00> : vector<8x32xf32>
    %16 = tpu.matmul %14, %15, %cst_14 {dimension_numbers = #tpu.dot_dimension_numbers<[1], [0], [0], [1], [0, 0, 1, 1], [], []>} : vector<8x32xf32>, vector<32x32xf32>, vector<8x32xf32> -> vector<8x32xf32>
    %c0_15 = arith.constant 0 : index
    %c0_16 = arith.constant 0 : index
    %17 = vector.load %arg7[%c0_15, %c0_16] : memref<1x32xf32, #tpu.memory_space<vmem>>, vector<1x32xf32>
    %18 = vector.broadcast %17 : vector<1x32xf32> to vector<8x32xf32>
    %19 = arith.addf %16, %18 : vector<8x32xf32>
    %cst_17 = arith.constant 0.000000e+00 : f32
    %20 = vector.broadcast %cst_17 : f32 to vector<8x32xf32>
    %21 = arith.maximumf %19, %20 : vector<8x32xf32>
    %c0_18 = arith.constant 0 : index
    %c0_19 = arith.constant 0 : index
    %22 = vector.load %arg8[%c0_18, %c0_19] : memref<32x128xf32, #tpu.memory_space<vmem>>, vector<32x128xf32>
    %cst_20 = arith.constant dense<0.000000e+00> : vector<8x128xf32>
    %23 = tpu.matmul %21, %22, %cst_20 {dimension_numbers = #tpu.dot_dimension_numbers<[1], [0], [0], [1], [0, 0, 1, 1], [], []>} : vector<8x32xf32>, vector<32x128xf32>, vector<8x128xf32> -> vector<8x128xf32>
    %c0_21 = arith.constant 0 : index
    %c0_22 = arith.constant 0 : index
    %24 = vector.load %arg9[%c0_21, %c0_22] : memref<1x128xf32, #tpu.memory_space<vmem>>, vector<1x128xf32>
    %25 = vector.broadcast %24 : vector<1x128xf32> to vector<8x128xf32>
    %26 = arith.addf %23, %25 : vector<8x128xf32>
    %c0_23 = arith.constant 0 : index
    %c0_24 = arith.constant 0 : index
    %27 = vector.load %arg10[%c0_23, %c0_24] : memref<8x128xf32, #tpu.memory_space<vmem>>, vector<8x128xf32>
    tpu.vector_store %arg10[%c0_23, %c0_24], %26 {strides = array<i32>} : memref<8x128xf32, #tpu.memory_space<vmem>>, vector<8x128xf32>,
    return
  }
  func.func @transform_0(%arg0: i32) -> (i32, i32) {
    %c0_i32 = arith.constant 0 : i32
    %c0_i32_0 = arith.constant 0 : i32
    return %arg0, %c0_i32 : i32, i32
  }
  func.func @transform_1(%arg0: i32) -> (i32, i32) {
    %c0_i32 = arith.constant 0 : i32
    %c0_i32_0 = arith.constant 0 : i32
    %c0_i32_1 = arith.constant 0 : i32
    return %c0_i32, %c0_i32_0 : i32, i32
  }
  func.func @transform_2(%arg0: i32) -> (i32, i32) {
    %c0_i32 = arith.constant 0 : i32
    %c0_i32_0 = arith.constant 0 : i32
    %c0_i32_1 = arith.constant 0 : i32
    return %c0_i32, %c0_i32_0 : i32, i32
  }
  func.func @transform_3(%arg0: i32) -> (i32, i32) {
    %c0_i32 = arith.constant 0 : i32
    %c0_i32_0 = arith.constant 0 : i32
    %c0_i32_1 = arith.constant 0 : i32
    return %c0_i32, %c0_i32_0 : i32, i32
  }
  func.func @transform_4(%arg0: i32) -> (i32, i32) {
    %c0_i32 = arith.constant 0 : i32
    %c0_i32_0 = arith.constant 0 : i32
    %c0_i32_1 = arith.constant 0 : i32
    return %c0_i32, %c0_i32_0 : i32, i32
  }
  func.func @transform_5(%arg0: i32) -> (i32, i32) {
    %c0_i32 = arith.constant 0 : i32
    %c0_i32_0 = arith.constant 0 : i32
    %c0_i32_1 = arith.constant 0 : i32
    return %c0_i32, %c0_i32_0 : i32, i32
  }
  func.func @transform_6(%arg0: i32) -> (i32, i32) {
    %c0_i32 = arith.constant 0 : i32
    %c0_i32_0 = arith.constant 0 : i32
    %c0_i32_1 = arith.constant 0 : i32
    return %c0_i32, %c0_i32_0 : i32, i32
  }
  func.func @transform_7(%arg0: i32) -> (i32, i32) {
    %c0_i32 = arith.constant 0 : i32
    %c0_i32_0 = arith.constant 0 : i32
    %c0_i32_1 = arith.constant 0 : i32
    return %c0_i32, %c0_i32_0 : i32, i32
  }
  func.func @transform_8(%arg0: i32) -> (i32, i32) {
    %c0_i32 = arith.constant 0 : i32
    %c0_i32_0 = arith.constant 0 : i32
    %c0_i32_1 = arith.constant 0 : i32
    return %c0_i32, %c0_i32_0 : i32, i32
  }
  func.func @transform_9(%arg0: i32) -> (i32, i32) {
    %c0_i32 = arith.constant 0 : i32
    %c0_i32_0 = arith.constant 0 : i32
    return %arg0, %c0_i32 : i32, i32
  }
}

</mosaic_0001>

<bundles_post_ra>
// kernel: lost_cities_forward.1
= control target key start
LH: loop header
LB: loop body
LE: loop exit
PB: predicated region body
PF: predicated region fallthrough
CT: control target
= control target key end

     0   :  { %s874_s30 = smov 0   ;;  %s986_s0 = inlined_call_operand.vmem [shape: f32[16,32], index: 0, kind: input, shape index: {}]   ;;  %s987_s1 = inlined_call_operand.vmem [shape: f32[32,32], index: 1, kind: input, shape index: {}]   ;;  %s988_s2 = inlined_call_operand.vmem [shape: f32[1,32], index: 2, kind: input, shape index: {}]   ;;  %s989_s3 = inlined_call_operand.vmem [shape: f32[32,32], index: 3, kind: input, shape index: {}]   ;;  %s990_s4 = inlined_call_operand.vmem [shape: f32[1,32], index: 4, kind: input, shape index: {}]   ;;  %s991_s5 = inlined_call_operand.vmem [shape: f32[32,32], index: 5, kind: input, shape index: {}]   ;;  %s992_s6 = inlined_call_operand.vmem [shape: f32[1,32], index: 6, kind: input, shape index: {}]   ;;  %s993_s7 = inlined_call_operand.vmem [shape: f32[32,128], index: 7, kind: input, shape index: {}]   ;;  %s994_s8 = inlined_call_operand.vmem [shape: f32[1,128], index: 8, kind: input, shape index: {}]   ;;  %s995_s9 = inlined_call_operand.vmem [shape: f32[16,128], index: 9, kind: output, shape index: {}]  }
   0x1 LB: > { %s723_s10 = sadd.s32 4294967295, %s820_s30   ;;  %p727_p0 = scmp.ge.s32.totalorder %s820_s30, 1  ;;  %s820_s30 = sphi %s874_s30, %s19_s30  }
   0x2   : > { %p286_p1 = scmp.lt.s32.totalorder %s820_s30, 3 }
   0x4   : > { %p287_p2 = pnand %p727_p0, %p286_p1 }
   0x5   : > { %p320_p3 = scmp.lt.s32.totalorder (!%p287_p2), %s723_s10, 1 }
   0x6   : > { %290 = sbr.rel (%p287_p2) target bundleno = 807 (0x327), region = 56 }
   0xb   : > { %v332_v0 = vld [vmem:[%s987_s1 + $0x18] sm:$0xff]  ;;  %v822_v1 = vmov 0.0   ;;  %v331_v2 = vld [vmem:[%s987_s1 + $0x10] sm:$0xff]  ;;  %vm823_vm0 = vmmov 0   ;;  %s997_s10 = smov (!%p320_p3, %s723_s10), 1  ;;  %v330_v4 = vld [vmem:[%s987_s1 + $0x8] sm:$0xff] }
   0xc   : > { %760 = vmatprep.subr.mxu0 %v822_v1  ;;  %768 = vmatprep.mubr.msk.f32.mxu0 %vm823_vm0, %v822_v1  ;;  %v418_v3 = vld [vmem:[%s989_s3 + $0x18] sm:$0xff]  ;;  %s728_s19 = sshll.u32 %s997_s10, 3  ;;  %v329_v5 = vld [vmem:[%s987_s1] sm:$0xff]  ;;  %vm340_vm1 = vcmask 261120   ;;  %v417_v7 = vld [vmem:[%s989_s3 + $0x10] sm:$0xff] }
   0xd   : > { %761 = vmatpush3.msra.mxu0 %v332_v0  ;;  %771 = vmatprep.subr.mxu1 %v822_v1  ;;  %s323_s24 = scalar_lea.vmem %s986_s0, %s728_s19  ;;  %v416_v8 = vld [vmem:[%s989_s3 + $0x8] sm:$0xff]  ;;  %v415_v9 = vld [vmem:[%s989_s3] sm:$0xff]  ;;  %v503_v10 = vld [vmem:[%s991_s5 + $0x18] sm:$0xff]  ;;  %s327_s21 = scalar_lea.vmem %s995_s9, %s728_s19 }
   0xe   : > { %762 = vmatprep.subr.mxu0 %v822_v1  ;;  %772 = vmatpush3.msra.mxu1 %v418_v3  ;;  %v328_v6 = vld [vmem:[%s323_s24] sm:$0xff]  ;;  %v502_v16 = vld [vmem:[%s991_s5 + $0x10] sm:$0xff]  ;;  %v501_v17 = vld [vmem:[%s991_s5 + $0x8] sm:$0xff] }
   0xf   : > { %763 = vmatpush3.msra.mxu0 %v331_v2  ;;  %773 = vmatprep.subr.mxu1 %v822_v1  ;;  %v730_v11 = vld [vmem:[%s988_s2] ss:$0 sm:$0xff]  ;;  %v588_v19 = vld [vmem:[%s993_s7 + $0x18] sm:$0xff]  ;;  %v587_v25 = vld [vmem:[%s993_s7 + $0x10] sm:$0xff] }
  0x10   : > { %764 = vmatprep.subr.mxu0 %v822_v1  ;;  %779 = vmatprep.mubr.msk.f32.mxu1 %vm823_vm0, %v822_v1  ;;  %v500_v18 = vld [vmem:[%s991_s5] sm:$0xff]  ;;  %v586_v26 = vld [vmem:[%s993_s7 + $0x8] sm:$0xff] }
  0x11   : > { %765 = vmatpush3.msra.mxu0 %v330_v4  ;;  %774 = vmatpush3.msra.mxu1 %v417_v7  ;;  %v732_v20 = vld [vmem:[%s990_s4] ss:$0 sm:$0xff] }
  0x12   : > { %766 = vmatprep.subr.mxu0 %v822_v1  ;;  %775 = vmatprep.subr.mxu1 %v822_v1  ;;  %v585_v27 = vld [vmem:[%s993_s7] sm:$0xff] }
  0x13   : > { %767 = vmatpush3.msra.mxu0 %v329_v5  ;;  %776 = vmatpush3.msra.mxu1 %v416_v8  ;;  %v734_v28 = vld [vmem:[%s992_s6] ss:$0 sm:$0xff] }
  0x14   : > { %769 = vmatmul.mubr.msk.f32.vlgmr.msra.gmra.mxu0 %vm340_vm1, %v328_v6  ;;  %782 = vmatprep.subr.mxu0 %v822_v1  ;;  %v736_v33 = vld [vmem:[%s994_s8] ss:$0 sm:$0xff] }
  0x15   : > { %790 = vmatprep.mubr.msk.f32.mxu0 %vm823_vm0, %v822_v1  ;;  %777 = vmatprep.subr.mxu1 %v822_v1 }
  0x16   : > { %778 = vmatpush3.msra.mxu1 %v415_v9  ;;  %783 = vmatpush3.msra.mxu0 %v503_v10 }
  0x17   : > { %793 = vmatprep.subr.mxu1 %v822_v1  ;;  %784 = vmatprep.subr.mxu0 %v822_v1 }
  0x18   : > { %785 = vmatpush3.msra.mxu0 %v502_v16 }
  0x19   : > { %786 = vmatprep.subr.mxu0 %v822_v1 }
  0x1a   : > { %787 = vmatpush3.msra.mxu0 %v501_v17 }
  0x1b   : > { %788 = vmatprep.subr.mxu0 %v822_v1 }
  0x1c   : > { %789 = vmatpush3.msra.mxu0 %v500_v18 }
  0xd4   : > { %v410_v12 = vpop.f32.mrf.mxu0 }
  0xd5   : > { %v411_v13 = vadd.f32 %v730_v11, %v410_v12 }
  0xd6   : > { %v770_v14 = vpop.f32.mrf.mxu0 }
  0xd7   : > { %v414_v15 = vmax.f32 %v411_v13, 0.0 }
  0xd9   : > { %780 = vmatmul.mubr.msk.f32.vlgmr.msra.gmra.mxu1 %vm340_vm1, %v414_v15 }
  0xda   : > { %801 = vmatprep.mubr.msk.f32.mxu1 %vm823_vm0, %v822_v1  ;;  %794 = vmatpush3.msra.mxu1 %v588_v19 }
  0xdb   : > { %795 = vmatprep.subr.mxu1 %v822_v1 }
  0xdc   : > { %796 = vmatpush3.msra.mxu1 %v587_v25 }
  0xdd   : > { %797 = vmatprep.subr.mxu1 %v822_v1 }
  0xde   : > { %798 = vmatpush3.msra.mxu1 %v586_v26 }
  0xdf   : > { %799 = vmatprep.subr.mxu1 %v822_v1 }
  0xe0   : > { %800 = vmatpush3.msra.mxu1 %v585_v27 }
 0x199   : > { %v495_v21 = vpop.f32.mrf.mxu1 }
 0x19a   : > { %v496_v22 = vadd.f32 %v732_v20, %v495_v21 }
 0x19b   : > { %v781_v23 = vpop.f32.mrf.mxu1 }
 0x19c   : > { %v499_v24 = vmax.f32 %v496_v22, 0.0 }
 0x19e   : > { %791 = vmatmul.mubr.msk.f32.vlgmr.msra.gmra.mxu0 %vm340_vm1, %v499_v24 }
 0x25e   : > { %v580_v29 = vpop.f32.mrf.mxu0 }
 0x25f   : > { %v581_v30 = vadd.f32 %v734_v28, %v580_v29 }
 0x260   : > { %v792_v31 = vpop.f32.mrf.mxu0 }
 0x261   : > { %v584_v32 = vmax.f32 %v581_v30, 0.0 }
 0x263   : > { %802 = vmatmul.mubr.msk.f32.vlgmr.msra.gmra.mxu1 %vm340_vm1, %v584_v32 }
 0x323   : > { %v665_v34 = vpop.f32.mrf.mxu1 }
 0x324   : > { %v666_v35 = vadd.f32 %v736_v33, %v665_v34 }
 0x325   : > { %v803_v36 = vpop.f32.mrf.mxu1 }
 0x326   : > { %669 = vst [vmem:[%s327_s21] sm:$0xff] %v666_v35 }
 0x327 PF: > { %s19_s30 = sadd.s32 1, %s820_s30  }
 0x328   : > { %p16_p4 = scmp.ge.s32.totalorder %s19_s30, 4  }
 0x32a   :  { %18 = sbr.rel (!%p16_p4) target bundleno = 1 (0x1), region = 86 }

</bundles_post_ra>
